<compile_context>
chip_gen: v7x
topology: tpu7x:2x2x1
jax: 0.10.0
libtpu: 0.0.40
codegen_flags: <defaults>
</compile_context>

<pallas_src>
import functools

import jax
import jax.numpy as jnp
from jax import lax
from jax.experimental import pallas as pl
from jax.experimental.pallas import tpu as pltpu


# ---------------------------------------------------------------- kernels ---

def _matmul_kernel(x_ref, w_ref, o_ref):
    # x: (TM, K), w: (K, N) resident across row tiles, o: (TM, N)
    o_ref[...] = jnp.dot(
        x_ref[...], w_ref[...], preferred_element_type=jnp.float32
    ).astype(o_ref.dtype)


def _flash_attn_kernel(q_ref, k_ref, v_ref, wo_ref, bo_ref, o_ref,
                       m_sc, l_sc, acc_sc, *,
                       heads, dim_head, scale, kv_len, tkv, need_mask):
    ki = pl.program_id(2)
    nk = pl.num_programs(2)

    @pl.when(ki == 0)
    def _init():
        m_sc[...] = jnp.full_like(m_sc, -jnp.inf)
        l_sc[...] = jnp.zeros_like(l_sc)
        acc_sc[...] = jnp.zeros_like(acc_sc)

    q = q_ref[0]                      # (TQ, inner)   input dtype
    k = k_ref[0]                      # (TKV, inner)
    v = v_ref[0]                      # (TKV, inner)

    if need_mask:                     # static; only when Nkv % TKV != 0
        col = lax.broadcasted_iota(jnp.int32, (q.shape[0], k.shape[0]), 1) + ki * tkv
        col_ok = col < kv_len

    for h in range(heads):            # static unroll, heads is small
        sl = slice(h * dim_head, (h + 1) * dim_head)
        qh = q[:, sl] * scale         # fold softmax scale into q (Nq*D muls)
        kh = k[:, sl]
        vh = v[:, sl]
        # contract last dims directly (no K transpose), f32 accumulation
        s = lax.dot_general(qh, kh, (((1,), (1,)), ((), ())),
                            preferred_element_type=jnp.float32)   # (TQ, TKV)
        if need_mask:
            s = jnp.where(col_ok, s, -jnp.inf)

        m_prev = m_sc[h]                                            # (TQ, 1)
        m_new = jnp.maximum(m_prev, jnp.max(s, axis=-1, keepdims=True))
        alpha = jnp.exp(m_prev - m_new)
        p = jnp.exp(s - m_new)                                      # f32
        l_sc[h] = alpha * l_sc[h] + jnp.sum(p, axis=-1, keepdims=True)
        acc_sc[:, sl] = alpha * acc_sc[:, sl] + jnp.dot(
            p.astype(vh.dtype), vh, preferred_element_type=jnp.float32)
        m_sc[h] = m_new

    @pl.when(ki == nk - 1)
    def _finalize():
        # per-head normalization into the lane-dense (TQ, inner) slab
        for h in range(heads):
            sl = slice(h * dim_head, (h + 1) * dim_head)
            acc_sc[:, sl] = acc_sc[:, sl] * pl.reciprocal(l_sc[h], approx=False)
        merged = acc_sc[...].astype(wo_ref.dtype)                   # (TQ, inner)
        # fused to_out: Linear(inner, C) + bias
        res = jnp.dot(merged, wo_ref[...], preferred_element_type=jnp.float32)
        res = res + bo_ref[...].astype(jnp.float32)
        o_ref[0] = res.astype(o_ref.dtype)


# ---------------------------------------------------------------- wrappers --

def _project(x2d, w_t, out_dtype, tm=512):
    """x2d (M, K) @ w_t (K, N) -> (M, N); M-tiled, weight VMEM-resident."""
    M, K = x2d.shape
    N = w_t.shape[1]
    TM = min(tm, M)
    return pl.pallas_call(
        _matmul_kernel,
        out_shape=jax.ShapeDtypeStruct((M, N), out_dtype),
        grid=(pl.cdiv(M, TM),),
        in_specs=[pl.BlockSpec((TM, K), lambda i: (i, 0)),
                  pl.BlockSpec((K, N), lambda i: (0, 0))],
        out_specs=pl.BlockSpec((TM, N), lambda i: (i, 0)),
        compiler_params=pltpu.CompilerParams(dimension_semantics=("parallel",)),
    )(x2d, w_t.astype(x2d.dtype))


def _fused_attention(q_src, kv_src, wo_t, bo, *, heads, dim_head,
                     q_col, k_col, v_col, out_dtype, tq=256, tkv=512):
    B, N, _ = q_src.shape
    _, Nkv, _ = kv_src.shape
    inner = heads * dim_head
    C = wo_t.shape[1]
    scale = float(dim_head) ** (-0.5)

    TQ = min(tq, N)
    TKV = min(tkv, Nkv)
    need_mask = (Nkv % TKV) != 0

    kernel = functools.partial(
        _flash_attn_kernel, heads=heads, dim_head=dim_head, scale=scale,
        kv_len=Nkv, tkv=TKV, need_mask=need_mask)

    return pl.pallas_call(
        kernel,
        out_shape=jax.ShapeDtypeStruct((B, N, C), out_dtype),
        grid=(B, pl.cdiv(N, TQ), pl.cdiv(Nkv, TKV)),
        in_specs=[
            # q / k / v selected out of the fused projection buffers purely by
            # the last-dim block index -> no HBM slicing or head transposes.
            pl.BlockSpec((1, TQ, inner), lambda b, qi, ki: (b, qi, q_col)),
            pl.BlockSpec((1, TKV, inner), lambda b, qi, ki: (b, ki, k_col)),
            pl.BlockSpec((1, TKV, inner), lambda b, qi, ki: (b, ki, v_col)),
            pl.BlockSpec((inner, C), lambda b, qi, ki: (0, 0)),   # Wo resident
            pl.BlockSpec((1, C), lambda b, qi, ki: (0, 0)),       # bias
        ],
        out_specs=pl.BlockSpec((1, TQ, C), lambda b, qi, ki: (b, qi, 0)),
        scratch_shapes=[
            pltpu.VMEM((heads, TQ, 1), jnp.float32),   # running max
            pltpu.VMEM((heads, TQ, 1), jnp.float32),   # running sum
            pltpu.VMEM((TQ, inner), jnp.float32),      # lane-dense accumulator
        ],
        compiler_params=pltpu.CompilerParams(
            dimension_semantics=("parallel", "parallel", "arbitrary")),
    )(q_src, kv_src, kv_src, wo_t, bo)


def cross_attention_forward(x, params, *, heads, dim_head, context=None):
    """x: (B, N, query_dim). context: (B, Nc, context_dim) or None (self-attn)."""
    B, N, C = x.shape
    inner = heads * dim_head
    dtype = x.dtype

    if context is None:
        # Fully fused QKV projection (x read once). In production the weight
        # concatenation would be folded into the params ahead of time.
        w_qkv = jnp.concatenate(
            [params["wq_t"], params["wk_t"], params["wv_t"]], axis=1)
        qkv = _project(x.reshape(B * N, C), w_qkv, dtype).reshape(B, N, 3 * inner)
        q_src, kv_src = qkv, qkv
        q_col, k_col, v_col = 0, 1, 2
    else:
        Bc, Nc, Cc = context.shape
        assert Bc == B, "context batch must match x batch"
        q_src = _project(x.reshape(B * N, C), params["wq_t"], dtype
                         ).reshape(B, N, inner)
        w_kv = jnp.concatenate([params["wk_t"], params["wv_t"]], axis=1)
        kv_src = _project(context.reshape(Bc * Nc, Cc).astype(dtype), w_kv, dtype
                          ).reshape(B, Nc, 2 * inner)
        q_col, k_col, v_col = 0, 0, 1

    return _fused_attention(
        q_src, kv_src, params["wo_t"].astype(dtype), params["bo"].astype(dtype),
        heads=heads, dim_head=dim_head,
        q_col=q_col, k_col=k_col, v_col=v_col, out_dtype=dtype)


# ------------------------------------------------------------- reference ----

def _reference(x, params, *, heads, dim_head, context=None):
    B, N, C = x.shape
    ctx = x if context is None else context
    Bc, Nc, Cc = ctx.shape
    q = x.reshape(B * N, C) @ params["wq_t"]
    k = ctx.reshape(Bc * Nc, Cc) @ params["wk_t"]
    v = ctx.reshape(Bc * Nc, Cc) @ params["wv_t"]
    q = q.reshape(B, N, heads, dim_head).transpose(0, 2, 1, 3)
    k = k.reshape(Bc, Nc, heads, dim_head).transpose(0, 2, 1, 3)
    v = v.reshape(Bc, Nc, heads, dim_head).transpose(0, 2, 1, 3)
    s = jnp.einsum("bhid,bhjd->bhij", q, k) * (dim_head ** -0.5)
    p = jax.nn.softmax(s, axis=-1)
    o = jnp.einsum("bhij,bhjd->bhid", p, v)
    o = o.transpose(0, 2, 1, 3).reshape(B * N, heads * dim_head)
    o = o @ params["wo_t"] + params["bo"]
    return o.reshape(B, N, C)


# ----------------------------------------------------------------- main -----

if __name__ == "__main__":
    # Small shapes consistent with the module: query_dim=32, heads=4, dim_head=32
    B, N, query_dim = 2, 16, 32
    heads, dim_head = 4, 32
    inner = heads * dim_head            # 128

    key = jax.random.PRNGKey(0)
    kx, kq, kk, kv, ko, kb, kc = jax.random.split(key, 7)

    x = jax.random.normal(kx, (B, N, query_dim), dtype=jnp.float32)

    # Weights stored pre-transposed: W^T with shape (in, out).
    params = {
        "wq_t": 0.05 * jax.random.normal(kq, (query_dim, inner), jnp.float32),
        "wk_t": 0.05 * jax.random.normal(kk, (query_dim, inner), jnp.float32),
        "wv_t": 0.05 * jax.random.normal(kv, (query_dim, inner), jnp.float32),
        "wo_t": 0.05 * jax.random.normal(ko, (inner, query_dim), jnp.float32),
        "bo":   0.05 * jax.random.normal(kb, (1, query_dim), jnp.float32),
    }

    # --- self-attention (context=None), f32, exact check ---
    out = cross_attention_forward(x, params, heads=heads, dim_head=dim_head)
    out = jax.block_until_ready(out)
    ref = _reference(x, params, heads=heads, dim_head=dim_head)
    assert out.shape == (B, N, query_dim), out.shape
    assert jnp.allclose(out, ref, atol=1e-4, rtol=1e-4), \
        float(jnp.max(jnp.abs(out - ref)))

    # --- cross-attention path (different token count context) ---
    Nc = 8
    ctx = jax.random.normal(kc, (B, Nc, query_dim), dtype=jnp.float32)
    out_c = cross_attention_forward(x, params, heads=heads, dim_head=dim_head,
                                    context=ctx)
    out_c = jax.block_until_ready(out_c)
    ref_c = _reference(x, params, heads=heads, dim_head=dim_head, context=ctx)
    assert jnp.allclose(out_c, ref_c, atol=1e-4, rtol=1e-4), \
        float(jnp.max(jnp.abs(out_c - ref_c)))

    # --- bf16 smoke test: intermediates follow input dtype, bf16 MXU path ---
    x_bf = x.astype(jnp.bfloat16)
    params_bf = jax.tree_util.tree_map(lambda p: p.astype(jnp.bfloat16), params)
    out_bf = cross_attention_forward(x_bf, params_bf, heads=heads,
                                     dim_head=dim_head)
    out_bf = jax.block_until_ready(out_bf)
    assert out_bf.dtype == jnp.bfloat16
    assert jnp.allclose(out_bf.astype(jnp.float32), ref, atol=5e-2, rtol=5e-2)

    print("KERNEL_OK")
</pallas_src>

<mosaic_0001>
module attributes {stable_mosaic.version = 11 : i64} {
  func.func @_matmul_kernel(%arg0: i32, %arg1: memref<32x32xf32, #tpu.memory_space<vmem>>, %arg2: memref<32x384xf32, #tpu.memory_space<vmem>>, %arg3: memref<32x384xf32, #tpu.memory_space<vmem>>) attributes {dimension_semantics = [#tpu.dimension_semantics<parallel>], iteration_bounds = array<i64: 1>, scalar_prefetch = 0 : i64, scratch_operands = 0 : i64, tpu.core_type = #tpu.core_type<tc>, window_params = [{transform_indices = @transform_0, window_bounds = array<i64: 32, 32>}, {pipeline_mode = #tpu.pipeline_mode<synchronous>, transform_indices = @transform_1, window_bounds = array<i64: 32, 384>}, {transform_indices = @transform_2, window_bounds = array<i64: 32, 384>}]} {
    %c0 = arith.constant 0 : index
    %c0_0 = arith.constant 0 : index
    %0 = vector.load %arg1[%c0, %c0_0] : memref<32x32xf32, #tpu.memory_space<vmem>>, vector<32x32xf32>
    %c0_1 = arith.constant 0 : index
    %c0_2 = arith.constant 0 : index
    %1 = vector.load %arg2[%c0_1, %c0_2] : memref<32x384xf32, #tpu.memory_space<vmem>>, vector<32x384xf32>
    %cst = arith.constant dense<0.000000e+00> : vector<32x384xf32>
    %2 = tpu.matmul %0, %1, %cst {dimension_numbers = #tpu.dot_dimension_numbers<[1], [0], [0], [1], [0, 0, 1, 1], [], []>} : vector<32x32xf32>, vector<32x384xf32>, vector<32x384xf32> -> vector<32x384xf32>
    %c0_3 = arith.constant 0 : index
    %c0_4 = arith.constant 0 : index
    %3 = vector.load %arg3[%c0_3, %c0_4] : memref<32x384xf32, #tpu.memory_space<vmem>>, vector<32x384xf32>
    tpu.vector_store %arg3[%c0_3, %c0_4], %2 {strides = array<i32>} : memref<32x384xf32, #tpu.memory_space<vmem>>, vector<32x384xf32>,
    return
  }
  func.func @transform_0(%arg0: i32) -> (i32, i32) {
    %c0_i32 = arith.constant 0 : i32
    %c0_i32_0 = arith.constant 0 : i32
    return %arg0, %c0_i32 : i32, i32
  }
  func.func @transform_1(%arg0: i32) -> (i32, i32) {
    %c0_i32 = arith.constant 0 : i32
    %c0_i32_0 = arith.constant 0 : i32
    %c0_i32_1 = arith.constant 0 : i32
    return %c0_i32, %c0_i32_0 : i32, i32
  }
  func.func @transform_2(%arg0: i32) -> (i32, i32) {
    %c0_i32 = arith.constant 0 : i32
    %c0_i32_0 = arith.constant 0 : i32
    return %arg0, %c0_i32 : i32, i32
  }
}

</mosaic_0001>

<bundles_post_ra>
// kernel: tpu_custom_call.1
= control target key start
LH: loop header
LB: loop body
LE: loop exit
PB: predicated region body
PF: predicated region fallthrough
CT: control target
= control target key end

     0   :  { %7 = vsyncpa [#allocation3], 0  ;;  %s472_s0 = inlined_call_operand.hbm [shape: f32[32,32], index: 0, kind: input, shape index: {}]   ;;  %s473_s1 = inlined_call_operand.hbm [shape: f32[32,384], index: 1, kind: input, shape index: {}]   ;;  %s474_s2 = inlined_call_operand.hbm [shape: f32[32,384], index: 2, kind: output, shape index: {}]  }
   0x1   :  { %8 = vsyncpa [#allocation6], 0 }
   0x2   :  { %9 = vsyncpa [#allocation4], 0  ;;  %s399_s9 = smov [#allocation2]   ;;  %s327_s13 = scalar_lea.hbm %s472_s0, 512 }
   0x3   :  { %s15_s10 = sshll.u32 %s399_s9, 4  ;;  %p328_p0 = scmp.ne.s32.totalorder %s472_s0, %s327_s13  ;;  %s16_s10 = int_to_ptr.vmem [resolvable:$true] %s15_s10 }
   0x4   :  { %p331_p1 = scmp.lt.u32.totalorder %s327_s13, %s472_s0 }
   0x6   :  { %p333_p2 = pnand %p331_p1, %p328_p0 }
   0x8   :  { %336 = shalt.err (!%p333_p2)
}
   0x9   :  { %s337_s18 = scalar_lea.vmem %s16_s10, 512  ;;  %p342_p4 = scmp.lt.s32.totalorder %s16_s10, %s16_s10 }
   0xa   :  { %p338_p3 = scmp.ne.s32.totalorder %s16_s10, %s337_s18  ;;  %p343_p5 = scmp.lt.s32.totalorder %s337_s18, %s337_s18 }
   0xc   :  { %p344_p6 = por %p343_p5, %p342_p4 }
   0xe   :  { %p345_p7 = pnand %p344_p6, %p338_p3 }
  0x10   :  { %348 = shalt.err (!%p345_p7)
}
  0x11   :  { %s400_s19 = smov 128   ;;  %s401_s20 = smov 8  }
  0x12   :  { %21 = dma.hbm_to_vmem [thread:$0]  %s472_s0, 512, %s16_s10, [#allocation3], %s400_s19, %s400_s19, %s401_s20  }
  0x13   :  { %s402_s23 = smov [#allocation5]   ;;  %s349_s27 = scalar_lea.hbm %s473_s1, 1536 }
  0x14   :  { %s27_s24 = sshll.u32 %s402_s23, 4  ;;  %p350_p8 = scmp.ne.s32.totalorder %s473_s1, %s349_s27  ;;  %s28_s24 = int_to_ptr.vmem [resolvable:$true] %s27_s24 }
  0x15   :  { %p353_p9 = scmp.lt.u32.totalorder %s349_s27, %s473_s1 }
  0x17   :  { %p355_p10 = pnand %p353_p9, %p350_p8 }
  0x19   :  { %358 = shalt.err (!%p355_p10)
}
  0x1a   :  { %s359_s4 = scalar_lea.vmem %s28_s24, 1536  ;;  %p364_p12 = scmp.lt.s32.totalorder %s28_s24, %s28_s24 }
  0x1b   :  { %p360_p11 = scmp.ne.s32.totalorder %s28_s24, %s359_s4  ;;  %p365_p13 = scmp.lt.s32.totalorder %s359_s4, %s359_s4 }
  0x1d   :  { %p366_p0 = por %p365_p13, %p364_p12 }
  0x1f   :  { %p367_p1 = pnand %p366_p0, %p360_p11 }
  0x21   :  { %370 = shalt.err (!%p367_p1)
}
  0x22   :  { %s403_s0 = smov 384   ;;  %s404_s5 = smov 24  }
  0x23   :  { %33 = dma.hbm_to_vmem [thread:$0]  %s473_s1, 1536, %s28_s24, [#allocation6], %s403_s0, %s403_s0, %s404_s5  }
  0x24   :  { %393 = dma.done.wait [#allocation3], 512  }
  0x25   :  { %394 = vsyncadd [#allocation3], 4294966784 }
  0x26   :  { %395 = dma.done.wait [#allocation6], 1536  }
  0x27   :  { %396 = vsyncadd [#allocation6], 4294965760  ;;  %v405_v0 = vmov 0.0   ;;  %v45_v1 = vld [vmem:[#allocation5 + $0x8] sm:$0xff]  ;;  %v48_v2 = vld [vmem:[#allocation5 + $0x20] sm:$0xff]  ;;  %vm56_vm0 = vcmask 261120  }
  0x28   :  { %133 = vmatprep.mubr.f32.mxu0 %v405_v0  ;;  %v44_v3 = vld [vmem:[#allocation5] sm:$0xff]  ;;  %v303_v4 = vpack.c.bf16 %v48_v2, %v45_v1  ;;  %v47_v5 = vld [vmem:[#allocation5 + $0x18] sm:$0xff]  ;;  %v54_v7 = vld [vmem:[#allocation5 + $0x50] sm:$0xff]  ;;  %s406_s1 = smov [#allocation7]  }
  0x29   :  { %v51_v6 = vld [vmem:[#allocation5 + $0x38] sm:$0xff]  ;;  %v305_v8 = vpack.c.bf16 %v47_v5, %v44_v3  ;;  %v50_v10 = vld [vmem:[#allocation5 + $0x30] sm:$0xff]  ;;  %v53_v11 = vld [vmem:[#allocation5 + $0x48] sm:$0xff]  ;;  %s260_s8 = sshll.u32 %s406_s1, 4  ;;  %s261_s8 = int_to_ptr.vmem [resolvable:$true] %s260_s8 }
  0x2a   :  { %v307_v9 = vpack.c.bf16 %v54_v7, %v51_v6  ;;  %v46_v12 = vld [vmem:[#allocation5 + $0x10] sm:$0xff]  ;;  %304 = vmatprep.subr.bf16.mxu0 %v303_v4  ;;  %v49_v13 = vld [vmem:[#allocation5 + $0x28] sm:$0xff]  ;;  %v40_v14 = vld [vmem:[#allocation2] sm:$0xff]  ;;  %v309_v16 = vpack.c.bf16 %v53_v11, %v50_v10  ;;  %s371_s9 = scalar_lea.vmem %s261_s8, 1536  ;;  %p376_p3 = scmp.lt.s32.totalorder %s261_s8, %s261_s8 }
  0x2b   :  { %v52_v15 = vld [vmem:[#allocation5 + $0x40] sm:$0xff]  ;;  %306 = vmatpush1.bf16.msra.mxu0 %v305_v8  ;;  %v311_v17 = vpack.c.bf16 %v49_v13, %v46_v12  ;;  %v55_v18 = vld [vmem:[#allocation5 + $0x58] sm:$0xff]  ;;  %297 = vmatprep.mubr.msk.f32.mxu1 %vm56_vm0, %v40_v14  ;;  %v41_v20 = vld [vmem:[#allocation2 + $0x8] sm:$0xff]  ;;  %p372_p2 = scmp.ne.s32.totalorder %s261_s8, %s371_s9  ;;  %p377_p4 = scmp.lt.s32.totalorder %s371_s9, %s371_s9 }
  0x2c   :  { %308 = vmatprep.subr.bf16.mxu0 %v307_v9  ;;  %v315_v19 = vpack.c.bf16 %v55_v18, %v52_v15  ;;  %v42_v21 = vld [vmem:[#allocation2 + $0x10] sm:$0xff]  ;;  %v43_v22 = vld [vmem:[#allocation2 + $0x18] sm:$0xff] }
  0x2d   :  { %312 = vmatprep.subr.bf16.mxu1 %v311_v17  ;;  %p378_p5 = por %p377_p4, %p376_p3 }
  0x2e   :  { %314 = vmatpush3.bf16.msra.mxu1 %v311_v17 }
  0x2f   :  { %310 = vmatpush1.bf16.msra.mxu0 %v309_v16  ;;  %316 = vmatprep.subr.bf16.mxu1 %v315_v19  ;;  %p379_p6 = pnand %p378_p5, %p372_p2 }
  0x32   :  { %273 = vmatmul.mubr.msk.f32.vlgmr.msra.gmra.mrb[0].mxu0 %vm56_vm0, %v40_v14  ;;  %318 = vmatpush3.bf16.msra.mxu1 %v315_v19 }
  0x33   :  { %139 = vmatprep.mubr.f32.mxu0 %v405_v0 }
  0x35   :  { %298 = vmatmul.mubr.msk.f32.vlgmr.msra.gmra.mrb[0].mxu1 %vm56_vm0, %v41_v20 }
  0x36   :  { %274 = vmatmul.mubr.msk.f32.gmra.mrb[2].mxu0 %vm56_vm0, %v41_v20  ;;  %300 = vmatprep.mubr.msk.f32.mxu1 %vm56_vm0, %v42_v21 }
  0x37   :  { %145 = vmatprep.mubr.f32.mxu0 %v405_v0 }
  0x39   :  { %301 = vmatmul.mubr.msk.f32.gmra.mrb[2].mxu1 %vm56_vm0, %v43_v22 }
  0x3a   :  { %275 = vmatmul.mubr.msk.f32.gmra.mrb[4].mxu0 %vm56_vm0, %v42_v21 }
  0x3b   :  { %151 = vmatprep.mubr.f32.mxu0 %v405_v0 }
  0x3e   :  { %276 = vmatmul.mubr.msk.f32.gmra.mrb[6].mxu0 %vm56_vm0, %v43_v22 }
 0x105   :  { %v135_v23 = vpop.f32.mrb[0].mxu0 }
 0x106   :  { %243 = vst [vmem:[#allocation7] sm:$0xff] %v135_v23  ;;  %v137_v24 = vpop.f32.mrb[1].mxu0 }
 0x107   :  { %244 = vst [vmem:[#allocation7 + $0x8] sm:$0xff] %v137_v24 }
 0x108   :  { %v299_v25 = vpop.f32.mrb[0].mxu1 }
 0x109   :  { %v141_v26 = vpop.f32.mrb[2].mxu0  ;;  %248 = vst [vmem:[#allocation7 + $0x28] sm:$0xff] %v299_v25  ;;  %v224_v27 = vpop.f32.mrb[1].mxu1 }
 0x10a   :  { %246 = vst [vmem:[#allocation7 + $0x18] sm:$0xff] %v141_v26  ;;  %v143_v28 = vpop.f32.mrb[3].mxu0  ;;  %245 = vst [vmem:[#allocation7 + $0x10] sm:$0xff] %v224_v27 }
 0x10b   :  { %247 = vst [vmem:[#allocation7 + $0x20] sm:$0xff] %v143_v28 }
 0x10c   :  { %v302_v29 = vpop.f32.mrb[2].mxu1 }
 0x10d   :  { %v147_v30 = vpop.f32.mrb[4].mxu0  ;;  %254 = vst [vmem:[#allocation7 + $0x58] sm:$0xff] %v302_v29  ;;  %v234_v31 = vpop.f32.mrb[3].mxu1 }
 0x10e   :  { %249 = vst [vmem:[#allocation7 + $0x30] sm:$0xff] %v147_v30  ;;  %v149_v32 = vpop.f32.mrb[5].mxu0  ;;  %251 = vst [vmem:[#allocation7 + $0x40] sm:$0xff] %v234_v31 }
 0x10f   :  { %250 = vst [vmem:[#allocation7 + $0x38] sm:$0xff] %v149_v32 }
 0x111   :  { %v153_v33 = vpop.f32.mrb[6].mxu0 }
 0x112   :  { %252 = vst [vmem:[#allocation7 + $0x48] sm:$0xff] %v153_v33  ;;  %v155_v34 = vpop.f32.mrb[7].mxu0 }
 0x113   :  { %253 = vst [vmem:[#allocation7 + $0x50] sm:$0xff] %v155_v34 }
 0x114   :  { %382 = shalt.err (!%p379_p6)
}
 0x115   :  { %s383_s12 = scalar_lea.hbm %s474_s2, 1536 }
 0x116   :  { %p384_p7 = scmp.ne.s32.totalorder %s474_s2, %s383_s12  ;;  %p387_p8 = scmp.lt.u32.totalorder %s383_s12, %s474_s2 }
 0x118   :  { %p389_p9 = pnand %p387_p8, %p384_p7 }
 0x11a   :  { %392 = shalt.err (!%p389_p9)
}
 0x11b   :  { %266 = dma.vmem_to_hbm [thread:$0]  %s261_s8, 1536, %s474_s2, [#allocation4], %s403_s0, %s403_s0, %s404_s5  }
 0x11c   :  { %397 = dma.done.wait [#allocation4], 1536  }
 0x11d   :  { %398 = vsyncadd [#allocation4], 4294965760 }
 0x11e   :  { %270 = vsyncpa [#allocation3], 1 }
 0x11f   :  { %271 = vsyncpa [#allocation6], 1 }
 0x120   :  { %272 = vsyncpa [#allocation4], 1 }

</bundles_post_ra>
